<compile_context>
chip_gen: v7x
topology: tpu7x:2x2x1
jax: 0.10.0
libtpu: 0.0.40
codegen_flags: <defaults>
</compile_context>

<pallas_src>
import jax
import jax.numpy as jnp
from jax.experimental import pallas as pl
from jax.experimental.pallas import tpu as pltpu


# ---------------------------------------------------------------------------
# Zero-copy identity: output aliases input, kernel body is a no-op.
# ---------------------------------------------------------------------------
def _alias_noop_kernel(x_ref, o_ref):
    # Output buffer IS the input buffer (aliased) -> nothing to do, no DMAs.
    del x_ref, o_ref


def _identity_aliased(x: jax.Array) -> jax.Array:
    return pl.pallas_call(
        _alias_noop_kernel,
        out_shape=jax.ShapeDtypeStruct(x.shape, x.dtype),
        in_specs=[pl.BlockSpec(memory_space=pl.ANY)],
        out_specs=pl.BlockSpec(memory_space=pl.ANY),
        input_output_aliases={0: 0},
        cost_estimate=pl.CostEstimate(flops=0, transcendentals=0, bytes_accessed=0),
    )(x)


def identity(x: jax.Array) -> jax.Array:
    """Pallas TPU Identity.forward: returns an array equal to x."""
    if x.size == 0:
        return x
    try:
        return _identity_aliased(x)
    except Exception:
        # Purely defensive: if the aliased no-op path were ever rejected by a
        # given toolchain, fall back to the materialized tiled copy below.
        return identity_copy(x)


# ---------------------------------------------------------------------------
# Materialized-copy identity (only if a fresh output buffer is required).
# ---------------------------------------------------------------------------
def _copy_kernel(x_ref, o_ref):
    o_ref[...] = x_ref[...]


_LANES = 512                           # lane-dense, large multiple of 128 -> unmasked vst
_TARGET_BLOCK_BYTES = 2 * 1024 * 1024  # ~2 MiB blocks; 2 arrays x 2 buffers = ~8 MiB VMEM


def identity_copy(x: jax.Array) -> jax.Array:
    orig_shape, dtype = x.shape, x.dtype
    n = x.size
    if n == 0:
        return x

    itemsize = jnp.dtype(dtype).itemsize
    # Sublane granularity: 8 for 32-bit, 16 for bf16/f16, 32 for int8/fp8.
    sub = max(8, 32 // itemsize)

    # 2-D lane-dense view (rows_p, _LANES); rows padded to a multiple of `sub`
    # so we never present a (1, n) / thin-sublane view.
    rows = pl.cdiv(n, _LANES)
    rows_p = pl.cdiv(rows, sub) * sub
    n_pad = rows_p * _LANES

    flat = x.reshape(-1)
    if n_pad != n:
        flat = jnp.pad(flat, (0, n_pad - n))
    x2d = flat.reshape(rows_p, _LANES)

    # Block rows: ~2 MiB target, multiple of `sub`, never larger than the array.
    tr = max(sub, (_TARGET_BLOCK_BYTES // (_LANES * itemsize)) // sub * sub)
    tr = min(tr, rows_p)
    grid = (pl.cdiv(rows_p, tr),)  # uneven division handled by Pallas boundary masking

    out2d = pl.pallas_call(
        _copy_kernel,
        out_shape=jax.ShapeDtypeStruct((rows_p, _LANES), dtype),
        grid_spec=pltpu.PrefetchScalarGridSpec(
            num_scalar_prefetch=0,
            grid=grid,
            in_specs=[pl.BlockSpec((tr, _LANES), lambda i: (i, 0))],
            out_specs=pl.BlockSpec((tr, _LANES), lambda i: (i, 0)),
        ),
        compiler_params=pltpu.CompilerParams(
            dimension_semantics=("parallel",),
        ),
        cost_estimate=pl.CostEstimate(
            flops=0, transcendentals=0, bytes_accessed=2 * n_pad * itemsize),
    )(x2d)

    return out2d.reshape(-1)[:n].reshape(orig_shape)


if __name__ == "__main__":
    key = jax.random.PRNGKey(0)
    k0, k1 = jax.random.split(key)

    # Small NCHW feature-map-shaped input, as implied by the original model.
    x = jax.random.normal(k0, (2, 4, 16, 16), dtype=jnp.float32)

    # Primary zero-copy (aliased) path.
    y = identity(x)
    jax.block_until_ready(y)
    assert y.shape == x.shape and y.dtype == x.dtype
    assert jnp.array_equal(y, x)

    # Materialized-copy path, including a non-128-divisible element count
    # (exercises the padding + lane-dense tiling logic).
    x2 = jax.random.normal(k1, (3, 5, 7, 11), dtype=jnp.float32)
    y2 = identity_copy(x2)
    jax.block_until_ready(y2)
    assert y2.shape == x2.shape and y2.dtype == x2.dtype
    assert jnp.array_equal(y2, x2)

    y3 = identity_copy(x)
    jax.block_until_ready(y3)
    assert jnp.array_equal(y3, x)

    print("KERNEL_OK")
</pallas_src>

<mosaic_0001>
module attributes {stable_mosaic.version = 11 : i64} {
  func.func @_alias_noop_kernel(%arg0: memref<2x4x16x16xf32, #tpu.memory_space<any>>, %arg1: memref<2x4x16x16xf32, #tpu.memory_space<any>>) attributes {dimension_semantics = [], scalar_prefetch = 0 : i64, scratch_operands = 0 : i64, tpu.core_type = #tpu.core_type<tc>} {
    return
  }
}

module attributes {stable_mosaic.version = 11 : i64} {
  func.func @_copy_kernel(%arg0: i32, %arg1: memref<8x512xf32, #tpu.memory_space<vmem>>, %arg2: memref<8x512xf32, #tpu.memory_space<vmem>>) attributes {dimension_semantics = [#tpu.dimension_semantics<parallel>], iteration_bounds = array<i64: 1>, scalar_prefetch = 0 : i64, scratch_operands = 0 : i64, tpu.core_type = #tpu.core_type<tc>, window_params = [{transform_indices = @transform_0, window_bounds = array<i64: 8, 512>}, {transform_indices = @transform_1, window_bounds = array<i64: 8, 512>}]} {
    %c0 = arith.constant 0 : index
    %c0_0 = arith.constant 0 : index
    %0 = vector.load %arg1[%c0, %c0_0] : memref<8x512xf32, #tpu.memory_space<vmem>>, vector<8x512xf32>
    %c0_1 = arith.constant 0 : index
    %c0_2 = arith.constant 0 : index
    %1 = vector.load %arg2[%c0_1, %c0_2] : memref<8x512xf32, #tpu.memory_space<vmem>>, vector<8x512xf32>
    tpu.vector_store %arg2[%c0_1, %c0_2], %0 {strides = array<i32>} : memref<8x512xf32, #tpu.memory_space<vmem>>, vector<8x512xf32>,
    return
  }
  func.func @transform_0(%arg0: i32) -> (i32, i32) {
    %c0_i32 = arith.constant 0 : i32
    %c0_i32_0 = arith.constant 0 : i32
    return %arg0, %c0_i32 : i32, i32
  }
  func.func @transform_1(%arg0: i32) -> (i32, i32) {
    %c0_i32 = arith.constant 0 : i32
    %c0_i32_0 = arith.constant 0 : i32
    return %arg0, %c0_i32 : i32, i32
  }
}

</mosaic_0001>

<bundles_post_ra>
// kernel: tpu_custom_call.1
= control target key start
LH: loop header
LB: loop body
LE: loop exit
PB: predicated region body
PF: predicated region fallthrough
CT: control target
= control target key end

     0   :  { %s16_s0 = inlined_call_operand.hbm [shape: f32[2,4,16,16], index: 0, kind: input, shape index: {}, may-alias: {0,1}]   ;;  %s17_s1 = inlined_call_operand.hbm [shape: f32[2,4,16,16], index: 1, kind: output, shape index: {}, may-alias: {0,1}]  }

// kernel: tpu_custom_call.1
= control target key start
LH: loop header
LB: loop body
LE: loop exit
PB: predicated region body
PF: predicated region fallthrough
CT: control target
= control target key end

     0   :  { %6 = vsyncpa [#allocation3], 0  ;;  %s130_s0 = inlined_call_operand.hbm [shape: f32[8,512], index: 0, kind: input, shape index: {}]   ;;  %s131_s1 = inlined_call_operand.hbm [shape: f32[8,512], index: 1, kind: output, shape index: {}]  }
   0x1   :  { %7 = vsyncpa [#allocation4], 0  ;;  %s94_s6 = smov [#allocation2]   ;;  %s46_s10 = scalar_lea.hbm %s130_s0, 512 }
   0x2   :  { %s14_s7 = sshll.u32 %s94_s6, 4  ;;  %p47_p0 = scmp.ne.s32.totalorder %s130_s0, %s46_s10  ;;  %s15_s7 = int_to_ptr.vmem [resolvable:$true] %s14_s7 }
   0x3   :  { %p50_p1 = scmp.lt.u32.totalorder %s46_s10, %s130_s0 }
   0x5   :  { %p52_p2 = pnand %p50_p1, %p47_p0 }
   0x7   :  { %55 = shalt.err (!%p52_p2)
}
   0x8   :  { %s56_s15 = scalar_lea.vmem %s15_s7, 512  ;;  %p61_p4 = scmp.lt.s32.totalorder %s15_s7, %s15_s7 }
   0x9   :  { %p57_p3 = scmp.ne.s32.totalorder %s15_s7, %s56_s15  ;;  %p62_p5 = scmp.lt.s32.totalorder %s56_s15, %s56_s15 }
   0xb   :  { %p63_p6 = por %p62_p5, %p61_p4 }
   0xd   :  { %p64_p7 = pnand %p63_p6, %p57_p3 }
   0xf   :  { %67 = shalt.err (!%p64_p7)
}
  0x10   :  { %17 = dma.hbm_to_vmem [thread:$0]  %s130_s0, 512, %s15_s7, [#allocation3]  }
  0x11   :  { %90 = dma.done.wait [#allocation3], 512  }
  0x12   :  { %91 = vsyncadd [#allocation3], 4294966784  ;;  %s95_s18 = smov [#allocation5]   ;;  %v21_v0 = vld [vmem:[#allocation2] sm:$0xff]  ;;  %v22_v1 = vld [vmem:[#allocation2 + $0x8] sm:$0xff] }
  0x13   :  { %s35_s19 = sshll.u32 %s95_s18, 4  ;;  %v23_v2 = vld [vmem:[#allocation2 + $0x10] sm:$0xff]  ;;  %25 = vst [vmem:[#allocation5] sm:$0xff] %v21_v0  ;;  %26 = vst [vmem:[#allocation5 + $0x8] sm:$0xff] %v22_v1  ;;  %v24_v3 = vld [vmem:[#allocation2 + $0x18] sm:$0xff]  ;;  %s36_s19 = int_to_ptr.vmem [resolvable:$true] %s35_s19 }
  0x14   :  { %27 = vst [vmem:[#allocation5 + $0x10] sm:$0xff] %v23_v2  ;;  %28 = vst [vmem:[#allocation5 + $0x18] sm:$0xff] %v24_v3  ;;  %s68_s20 = scalar_lea.vmem %s36_s19, 512  ;;  %p73_p9 = scmp.lt.s32.totalorder %s36_s19, %s36_s19 }
  0x15   :  { %p69_p8 = scmp.ne.s32.totalorder %s36_s19, %s68_s20  ;;  %p74_p10 = scmp.lt.s32.totalorder %s68_s20, %s68_s20 }
  0x17   :  { %p75_p11 = por %p74_p10, %p73_p9 }
  0x19   :  { %p76_p12 = pnand %p75_p11, %p69_p8 }
  0x1b   :  { %79 = shalt.err (!%p76_p12)
}
  0x1c   :  { %s80_s22 = scalar_lea.hbm %s131_s1, 512 }
  0x1d   :  { %p81_p13 = scmp.ne.s32.totalorder %s131_s1, %s80_s22  ;;  %p84_p0 = scmp.lt.u32.totalorder %s80_s22, %s131_s1 }
  0x1f   :  { %p86_p1 = pnand %p84_p0, %p81_p13 }
  0x21   :  { %89 = shalt.err (!%p86_p1)
}
  0x22   :  { %38 = dma.vmem_to_hbm [thread:$0]  %s36_s19, 512, %s131_s1, [#allocation4]  }
  0x23   :  { %92 = dma.done.wait [#allocation4], 512  }
  0x24   :  { %93 = vsyncadd [#allocation4], 4294966784 }
  0x25   :  { %42 = vsyncpa [#allocation3], 1 }
  0x26   :  { %43 = vsyncpa [#allocation4], 1 }

</bundles_post_ra>
